<compile_context>
chip_gen: v7x
topology: tpu7x:2x2x1
jax: 0.10.0
libtpu: 0.0.40
codegen_flags: <defaults>
</compile_context>

<pallas_src>
import jax
import jax.numpy as jnp
from jax.experimental import pallas as pl
from jax.experimental.pallas import tpu as pltpu

_LANE = 128
_MIB = 1024 * 1024


def _round_up(x: int, m: int) -> int:
    return -(-x // m) * m


def _vmem_capacity_bytes() -> int:
    """Best-effort physical-VMEM query; conservative (v7x, 64 MiB) fallback."""
    try:
        cap = int(getattr(pltpu.get_tpu_info(), "vmem_capacity_bytes", 0))
        if cap > 0:
            return cap
    except Exception:
        pass
    try:
        kind = jax.devices()[0].device_kind.lower()
        if "v7" in kind:
            return 64 * _MIB
        if any(g in kind for g in ("v4", "v5", "v6")):
            return 128 * _MIB
    except Exception:
        pass
    return 64 * _MIB


def _chomp_copy_kernel(x_ref, o_ref):
    # Whole-tile copy.  Input/output blocks have identical shapes; the chomp
    # happens entirely in the BlockSpec geometry (output array is T_out wide,
    # so out-of-range lanes in the last column tile are masked on writeback).
    o_ref[...] = x_ref[...]


def chomp1d(x: jax.Array, chomp_size: int, *, rows_tile: int | None = None,
            col_tile: int | None = None, force_pallas: bool = False) -> jax.Array:
    """Pallas equivalent of Chomp1d.forward: x[:, :, :, :-chomp_size]."""
    assert x.ndim == 4, "expected (B, C, N, T) input"
    B, C, N, T = x.shape
    assert 0 < chomp_size < T, "chomp_size must be in (0, T)"
    T_out = T - chomp_size

    itemsize = jnp.dtype(x.dtype).itemsize

    # Tiny tensors: the fused XLA slice is strictly faster than a pallas_call.
    if not force_pallas and x.size * itemsize < 2 * _MIB:
        return x[:, :, :, :-chomp_size]

    rows = B * C * N
    x2 = x.reshape(rows, T)  # metadata-only reshape of a contiguous array

    # ---- Generation-aware budgets (padded-footprint accounting) ------------
    vmem_cap = _vmem_capacity_bytes()
    if vmem_cap >= 128 * _MIB:      # v4 / v5e / v6e: 128 MiB physical VMEM
        vmem_limit = 64 * _MIB
        pair_budget = 24 * _MIB     # one in+out tile pair; x2 double-buffered
    else:                           # v7x: 64 MiB physical VMEM
        vmem_limit = 48 * _MIB
        pair_budget = 12 * _MIB

    # Dtype-native sublane multiple: 8 (f32) / 16 (bf16) / 32 (int8 / fp8).
    sub = max(8, 32 // itemsize)

    # ---- Column (lane) tiling ----------------------------------------------
    # Never read past round_up(T_out, 128): tail columns beyond that are
    # skipped at the DMA level.  Cap the width so a minimum-height tile pair
    # still fits the budget (handles long-T / few-row inputs via 2-D tiling).
    T_out_padded = _round_up(T_out, _LANE)
    if col_tile is None:
        max_col = max(_LANE, (pair_budget // (2 * sub * itemsize)) // _LANE * _LANE)
        col_tile = min(T_out_padded, max_col)
    else:
        col_tile = int(col_tile)
        assert col_tile > 0 and col_tile % _LANE == 0
        col_tile = min(col_tile, T_out_padded)
    num_col_tiles = pl.cdiv(T_out, col_tile)

    # ---- Row (sublane) tiling ----------------------------------------------
    if rows_tile is None:
        per_row_bytes = 2 * col_tile * itemsize          # padded in + out row
        rows_tile = max(sub, (pair_budget // per_row_bytes) // sub * sub)
        # Keep >= ~8 grid steps so read/writeback DMAs stay overlapped and
        # v7x's two TensorCores both get work.
        desired_row_steps = max(1, -(-8 // num_col_tiles))
        row_cap = max(sub, _round_up(-(-rows // desired_row_steps), sub))
        rows_tile = min(rows_tile, row_cap)
    rows_tile = int(rows_tile)
    if rows_tile >= rows:
        rows_tile = rows                                  # full-dim block is legal
    else:
        rows_tile = max(sub, (rows_tile // sub) * sub)    # sublane-aligned tile

    grid = (pl.cdiv(rows, rows_tile), num_col_tiles)

    out2 = pl.pallas_call(
        _chomp_copy_kernel,
        out_shape=jax.ShapeDtypeStruct((rows, T_out), x.dtype),
        grid_spec=pl.GridSpec(
            grid=grid,
            in_specs=[pl.BlockSpec((rows_tile, col_tile), lambda i, j: (i, j))],
            out_specs=pl.BlockSpec((rows_tile, col_tile), lambda i, j: (i, j)),
        ),
        compiler_params=pltpu.CompilerParams(
            dimension_semantics=("parallel", "parallel"),
            vmem_limit_bytes=vmem_limit,
        ),
    )(x2)

    return out2.reshape(B, C, N, T_out)


if __name__ == "__main__":
    key = jax.random.PRNGKey(0)

    # Shapes consistent with the module's usage: (batch, channels, nodes, time).
    B, C, N, T = 2, 4, 16, 16
    chomp_size = 3
    x = jax.random.normal(key, (B, C, N, T), dtype=jnp.float32)
    y_ref = x[:, :, :, :-chomp_size]

    # 1) Default path (tiny tensor -> short-circuit slice).
    y0 = chomp1d(x, chomp_size)
    jax.block_until_ready(y0)
    assert y0.shape == (B, C, N, T - chomp_size) and y0.dtype == x.dtype
    assert jnp.array_equal(y0, y_ref)

    # 2) Pallas kernel path on the same small shape (unaligned T_out = 13).
    y1 = chomp1d(x, chomp_size, force_pallas=True)
    jax.block_until_ready(y1)
    assert jnp.array_equal(y1, y_ref)

    # 3) Pallas kernel path with lane-aligned T_out (T=259 -> T_out=256),
    #    exercising the tail-skipping narrowed input block.
    x2 = jax.random.normal(key, (B, C, N, 259), dtype=jnp.float32)
    y2 = chomp1d(x2, 3, force_pallas=True)
    jax.block_until_ready(y2)
    assert jnp.array_equal(y2, x2[:, :, :, :-3])

    # 4) Multi-column-tile path (2-D grid over the time axis).
    y3 = chomp1d(x2, 3, force_pallas=True, col_tile=128)
    jax.block_until_ready(y3)
    assert jnp.array_equal(y3, x2[:, :, :, :-3])

    print("KERNEL_OK")
</pallas_src>

<mosaic_0001>
module attributes {stable_mosaic.version = 11 : i64} {
  func.func @_chomp_copy_kernel(%arg0: i32, %arg1: i32, %arg2: memref<16x128xf32, #tpu.memory_space<vmem>>, %arg3: memref<16x128xf32, #tpu.memory_space<vmem>>) attributes {dimension_semantics = [#tpu.dimension_semantics<parallel>, #tpu.dimension_semantics<parallel>], iteration_bounds = array<i64: 8, 1>, scalar_prefetch = 0 : i64, scratch_operands = 0 : i64, tpu.core_type = #tpu.core_type<tc>, window_params = [{transform_indices = @transform_0, window_bounds = array<i64: 16, 128>}, {transform_indices = @transform_1, window_bounds = array<i64: 16, 128>}]} {
    %c0 = arith.constant 0 : index
    %c0_0 = arith.constant 0 : index
    %0 = vector.load %arg2[%c0, %c0_0] : memref<16x128xf32, #tpu.memory_space<vmem>>, vector<16x128xf32>
    %c0_1 = arith.constant 0 : index
    %c0_2 = arith.constant 0 : index
    %1 = vector.load %arg3[%c0_1, %c0_2] : memref<16x128xf32, #tpu.memory_space<vmem>>, vector<16x128xf32>
    tpu.vector_store %arg3[%c0_1, %c0_2], %0 {strides = array<i32>} : memref<16x128xf32, #tpu.memory_space<vmem>>, vector<16x128xf32>,
    return
  }
  func.func @transform_0(%arg0: i32, %arg1: i32) -> (i32, i32) {
    %c0_i32 = arith.constant 0 : i32
    return %arg0, %arg1 : i32, i32
  }
  func.func @transform_1(%arg0: i32, %arg1: i32) -> (i32, i32) {
    %c0_i32 = arith.constant 0 : i32
    return %arg0, %arg1 : i32, i32
  }
}

</mosaic_0001>

<bundles_post_ra>
// kernel: tpu_custom_call.1
= control target key start
LH: loop header
LB: loop body
LE: loop exit
PB: predicated region body
PF: predicated region fallthrough
CT: control target
= control target key end

     0   :  { %s302_s6 = smov 0   ;;  %s304_s7 = smov 0   ;;  %s318_s0 = inlined_call_operand.vmem [shape: f32[128,16], index: 0, kind: input, shape index: {}]   ;;  %s319_s1 = inlined_call_operand.vmem [shape: f32[128,13], index: 1, kind: output, shape index: {}]  }
   0x1   :  { %s288_s8 = smov 0  }
   0x2 LB: > { %s23_s9 = sadd.s32 1, %s286_s7  ;;  %p237_p0 = scmp.ge.s32.totalorder %s290_s8, 1  ;;  %s290_s8 = sphi %s288_s8, %s11_s8   ;;  %s286_s7 = sphi %s304_s7, %s321_s7   ;;  %s282_s6 = sphi %s302_s6, %s320_s6  }
   0x3   : > { %p25_p1 = scmp.ge.s32.totalorder %s23_s9, 8  ;;  %p107_p2 = scmp.lt.s32.totalorder %s290_s8, 9 }
   0x5   : > { %s323_s9 = smov (%p25_p1, %s23_s9), 0  ;;  %p108_p3 = pnand %p237_p0, %p107_p2 }
   0x6   : > { %s238_s10 = sshll.u32 (!%p108_p3), %s282_s6, 1 }
   0x7   : > { %111 = sbr.rel (%p108_p3) target bundleno = 19 (0x13), region = 24  ;;  %p134_p4 = scmp.lt.s32.totalorder (!%p108_p3), %s238_s10, 15 }
   0xe   : > { %s325_s10 = smov (!%p134_p4, %s238_s10), 15 }
   0xf   : > { %s239_s11 = sshll.u32 %s325_s10, 3 }
  0x10   : > { %s140_s14 = scalar_lea.vmem %s318_s0, %s239_s11  ;;  %s149_s17 = scalar_lea.vmem %s319_s1, %s239_s11 }
  0x11   : > { %v151_v0 = vld [vmem:[%s140_s14] sm:$0xff]  ;;  %v152_v1 = vld [vmem:[%s140_s14 + $0x8] sm:$0xff] }
  0x12   : > { %153 = vst [vmem:[%s149_s17] sm:$0xff] %v151_v0  ;;  %154 = vst [vmem:[%s149_s17 + $0x8] sm:$0xff] %v152_v1 }
  0x13 PF: > { %s11_s8 = sadd.s32 1, %s290_s8   ;;  %s320_s6 = smov %s286_s7 }
  0x14   : > { %p8_p5 = scmp.ge.s32.totalorder %s11_s8, 10   ;;  %s321_s7 = smov %s323_s9 }
  0x16   :  { %10 = sbr.rel (!%p8_p5) target bundleno = 2 (0x2), region = 54 }

</bundles_post_ra>
